<compile_context>
chip_gen: v6e
topology: v6e:2x2x1
jax: 0.10.0
libtpu: 0.0.40
codegen_flags: <defaults>
</compile_context>

<pallas_src>
import jax
import jax.numpy as jnp
from jax.experimental import pallas as pl
from jax.experimental.pallas import tpu as pltpu


def _round_up(x, m):
    return ((x + m - 1) // m) * m


def _cdiv(a, b):
    return (a + b - 1) // b


def _pick_tile(dim, tmax, align):
    """Largest tile <= tmax (multiple of `align`) minimizing padding waste.

    Splits `dim` into ceil(dim / tmax) equal chunks and rounds the chunk up to
    `align`, so total padding never exceeds one sub-tile's worth of rows/cols.
    (For production shapes where N, K are multiples of 256 this lands on
    256-wide MXU-friendly panels automatically.)
    """
    tmax = max(align, (tmax // align) * align)
    steps = _cdiv(dim, tmax)
    return _round_up(_cdiv(dim, steps), align)


# ---------------------------------------------------------------------------
# Kernels
# ---------------------------------------------------------------------------
def _linear_kernel_f32_out(x_ref, wt_ref, b_ref, o_ref):
    """f32 output: accumulate directly into the resident output tile."""
    k = pl.program_id(2)

    @pl.when(k == 0)
    def _():
        o_ref[...] = jnp.zeros_like(o_ref)

    o_ref[...] += jnp.dot(
        x_ref[...].astype(wt_ref.dtype), wt_ref[...],
        preferred_element_type=jnp.float32,
    )

    @pl.when(k == pl.num_programs(2) - 1)
    def _():
        o_ref[...] = o_ref[...] + b_ref[...]


def _linear_kernel_acc(x_ref, wt_ref, b_ref, o_ref, acc_ref):
    """Narrow (e.g. bf16) output: f32 VMEM accumulator + single cast epilogue."""
    k = pl.program_id(2)

    @pl.when(k == 0)
    def _():
        acc_ref[...] = jnp.zeros_like(acc_ref)

    acc_ref[...] += jnp.dot(
        x_ref[...].astype(wt_ref.dtype), wt_ref[...],
        preferred_element_type=jnp.float32,
    )

    @pl.when(k == pl.num_programs(2) - 1)
    def _():
        o_ref[...] = (acc_ref[...] + b_ref[...]).astype(o_ref.dtype)


# ---------------------------------------------------------------------------
# Wrapper
# ---------------------------------------------------------------------------
def make_linear_fn(w, b, *, tm_max=512, tn_max=1024, tk_max=1024,
                   compute_dtype=None):
    """Prepare MyLinear params ONCE; return a jitted apply(x) = x @ w.T + b.

    w: (out_features, in_features) = (N, K); b: (N,).
    The transpose to (K, N) and the lane-dense padding happen here (parameter
    load time), not in the per-call path.
    """
    w = jnp.asarray(w)
    b = jnp.asarray(b)
    N, K = w.shape

    # Tile sizes along N / K depend only on the (static) weight shape.
    tn = _pick_tile(N, tn_max, 128)
    tk = _pick_tile(K, tk_max, 128)
    Np = _round_up(N, tn)
    Kp = _round_up(K, tk)

    wt = w.T
    if compute_dtype is not None:
        wt = wt.astype(compute_dtype)  # e.g. bf16 inputs, f32 accumulation
    if (Kp, Np) != (K, N):
        wt = jnp.pad(wt, ((0, Kp - K), (0, Np - N)))
    b2d = (jnp.pad(b, (0, Np - N)) if Np != N else b).astype(jnp.float32)
    b2d = b2d.reshape(1, Np)

    wt = jax.device_put(wt)
    b2d = jax.device_put(b2d)

    @jax.jit
    def apply(x):
        lead = x.shape[:-1]
        x2d = x.reshape(-1, x.shape[-1])
        M, Kx = x2d.shape
        assert Kx == K, "in_features mismatch"

        # M tiling: for small-M inference this puts all of M in one tile and
        # lets the (parallel) N axis carry the multi-core split.
        tm = _pick_tile(M, tm_max, 8)
        Mp = _round_up(M, tm)
        x_p = x2d
        if (Mp, Kp) != (M, K):
            x_p = jnp.pad(x2d, ((0, Mp - M), (0, Kp - K)))

        grid = (Mp // tm, Np // tn, Kp // tk)

        out_dtype = x2d.dtype
        f32_out = out_dtype == jnp.float32
        kernel = _linear_kernel_f32_out if f32_out else _linear_kernel_acc
        scratch = [] if f32_out else [pltpu.VMEM((tm, tn), jnp.float32)]

        # VMEM budget: double-buffered inputs + double-buffered output (+ acc).
        x_bytes = tm * tk * x_p.dtype.itemsize
        w_bytes = tk * tn * wt.dtype.itemsize
        o_bytes = tm * tn * jnp.dtype(out_dtype).itemsize
        workset = 2 * (x_bytes + w_bytes + tn * 4) + 2 * o_bytes
        if not f32_out:
            workset += tm * tn * 4
        # Explicit limit with headroom; 48 MiB stays inside v7x's 64 MiB
        # physical VMEM and is trivially safe on v5e/v6e (128 MiB physical).
        vmem_limit = int(max(32 << 20, min(48 << 20, workset + (8 << 20))))

        out_p = pl.pallas_call(
            kernel,
            out_shape=jax.ShapeDtypeStruct((Mp, Np), out_dtype),
            grid_spec=pltpu.PrefetchScalarGridSpec(
                num_scalar_prefetch=0,
                grid=grid,
                in_specs=[
                    pl.BlockSpec((tm, tk), lambda i, j, k: (i, k)),  # x tile
                    pl.BlockSpec((tk, tn), lambda i, j, k: (k, j)),  # w.T tile
                    pl.BlockSpec((1, tn), lambda i, j, k: (0, j)),   # bias tile
                ],
                out_specs=pl.BlockSpec((tm, tn), lambda i, j, k: (i, j)),
                scratch_shapes=scratch,
            ),
            compiler_params=pltpu.CompilerParams(
                dimension_semantics=("parallel", "parallel", "arbitrary"),
                vmem_limit_bytes=vmem_limit,
            ),
            cost_estimate=pl.CostEstimate(
                flops=2 * Mp * Np * Kp,
                transcendentals=0,
                # Real streaming: x re-read per N-tile, weight re-read per M-tile.
                bytes_accessed=(
                    x_p.dtype.itemsize * Mp * Kp * grid[1]
                    + wt.dtype.itemsize * Kp * Np * grid[0]
                    + jnp.dtype(out_dtype).itemsize * Mp * Np
                ),
            ),
        )(x_p, wt, b2d)

        return out_p[:M, :N].reshape(*lead, N)

    return apply


def my_linear(x, w, b):
    """One-shot convenience wrapper (prefer make_linear_fn for repeated calls)."""
    return make_linear_fn(w, b)(x)


if __name__ == "__main__":
    key = jax.random.PRNGKey(0)
    kx, kw, kb = jax.random.split(key, 3)

    # Shapes implied by MyLinear(in_put, out_put) on a small batch.
    # NOTE: at these toy sizes the kernel is pure per-call overhead vs a fused
    # XLA dot — the tiling only pays off at production (M, K, N).
    batch, in_put, out_put = 8, 32, 16

    x = jax.random.normal(kx, (batch, in_put), dtype=jnp.float32)
    w = jax.random.normal(kw, (out_put, in_put), dtype=jnp.float32)  # torch.randn(out, in)
    b = jax.random.normal(kb, (out_put,), dtype=jnp.float32)         # torch.randn(out)

    linear = make_linear_fn(w, b)
    y = jax.block_until_ready(linear(x))

    # Correctness check vs plain JAX reference.
    y_ref = x @ w.T + b
    assert y.shape == (batch, out_put)
    assert jnp.allclose(y, y_ref, atol=1e-5, rtol=1e-5)

    print("KERNEL_OK")
</pallas_src>

<mosaic_0001>
module attributes {stable_mosaic.version = 11 : i64} {
  func.func @_linear_kernel_f32_out(%arg0: i32, %arg1: i32, %arg2: i32, %arg3: memref<8x128xf32, #tpu.memory_space<vmem>>, %arg4: memref<128x128xf32, #tpu.memory_space<vmem>>, %arg5: memref<1x128xf32, #tpu.memory_space<vmem>>, %arg6: memref<8x128xf32, #tpu.memory_space<vmem>>) attributes {dimension_semantics = [#tpu.dimension_semantics<parallel>, #tpu.dimension_semantics<parallel>, #tpu.dimension_semantics<arbitrary>], iteration_bounds = array<i64: 1, 1, 1>, scalar_prefetch = 0 : i64, scratch_operands = 0 : i64, tpu.core_type = #tpu.core_type<tc>, window_params = [{transform_indices = @transform_0, window_bounds = array<i64: 8, 128>}, {transform_indices = @transform_1, window_bounds = array<i64: 128, 128>}, {transform_indices = @transform_2, window_bounds = array<i64: 1, 128>}, {transform_indices = @transform_3, window_bounds = array<i64: 8, 128>}]} {
    %c0_i32 = arith.constant 0 : i32
    %0 = arith.cmpi eq, %arg2, %c0_i32 : i32
    %1 = arith.extui %0 : i1 to i32
    %c0_i32_0 = arith.constant 0 : i32
    %2 = arith.cmpi ne, %1, %c0_i32_0 : i32
    scf.if %2 {
      %cst_10 = arith.constant 0.000000e+00 : f32
      %12 = vector.broadcast %cst_10 : f32 to vector<8x128xf32>
      %c0_11 = arith.constant 0 : index
      %c0_12 = arith.constant 0 : index
      %13 = vector.load %arg6[%c0_11, %c0_12] : memref<8x128xf32, #tpu.memory_space<vmem>>, vector<8x128xf32>
      tpu.vector_store %arg6[%c0_11, %c0_12], %12 {strides = array<i32>} : memref<8x128xf32, #tpu.memory_space<vmem>>, vector<8x128xf32>,
    } else {
    }
    %c0 = arith.constant 0 : index
    %c0_1 = arith.constant 0 : index
    %3 = vector.load %arg6[%c0, %c0_1] : memref<8x128xf32, #tpu.memory_space<vmem>>, vector<8x128xf32>
    %c0_2 = arith.constant 0 : index
    %c0_3 = arith.constant 0 : index
    %4 = vector.load %arg3[%c0_2, %c0_3] : memref<8x128xf32, #tpu.memory_space<vmem>>, vector<8x128xf32>
    %c0_4 = arith.constant 0 : index
    %c0_5 = arith.constant 0 : index
    %5 = vector.load %arg4[%c0_4, %c0_5] : memref<128x128xf32, #tpu.memory_space<vmem>>, vector<128x128xf32>
    %cst = arith.constant dense<0.000000e+00> : vector<8x128xf32>
    %6 = tpu.matmul %4, %5, %cst {dimension_numbers = #tpu.dot_dimension_numbers<[1], [0], [0], [1], [0, 0, 1, 1], [], []>} : vector<8x128xf32>, vector<128x128xf32>, vector<8x128xf32> -> vector<8x128xf32>
    %7 = arith.addf %3, %6 : vector<8x128xf32>
    %c0_6 = arith.constant 0 : index
    %c0_7 = arith.constant 0 : index
    %8 = vector.load %arg6[%c0_6, %c0_7] : memref<8x128xf32, #tpu.memory_space<vmem>>, vector<8x128xf32>
    tpu.vector_store %arg6[%c0_6, %c0_7], %7 {strides = array<i32>} : memref<8x128xf32, #tpu.memory_space<vmem>>, vector<8x128xf32>,
    %c0_i32_8 = arith.constant 0 : i32
    %9 = arith.cmpi eq, %arg2, %c0_i32_8 : i32
    %10 = arith.extui %9 : i1 to i32
    %c0_i32_9 = arith.constant 0 : i32
    %11 = arith.cmpi ne, %10, %c0_i32_9 : i32
    scf.if %11 {
      %c0_10 = arith.constant 0 : index
      %c0_11 = arith.constant 0 : index
      %12 = vector.load %arg6[%c0_10, %c0_11] : memref<8x128xf32, #tpu.memory_space<vmem>>, vector<8x128xf32>
      %c0_12 = arith.constant 0 : index
      %c0_13 = arith.constant 0 : index
      %13 = vector.load %arg5[%c0_12, %c0_13] : memref<1x128xf32, #tpu.memory_space<vmem>>, vector<1x128xf32>
      %14 = vector.broadcast %13 : vector<1x128xf32> to vector<8x128xf32>
      %15 = arith.addf %12, %14 : vector<8x128xf32>
      %c0_14 = arith.constant 0 : index
      %c0_15 = arith.constant 0 : index
      %16 = vector.load %arg6[%c0_14, %c0_15] : memref<8x128xf32, #tpu.memory_space<vmem>>, vector<8x128xf32>
      tpu.vector_store %arg6[%c0_14, %c0_15], %15 {strides = array<i32>} : memref<8x128xf32, #tpu.memory_space<vmem>>, vector<8x128xf32>,
    } else {
    }
    return
  }
  func.func @transform_0(%arg0: i32, %arg1: i32, %arg2: i32) -> (i32, i32) {
    %c0_i32 = arith.constant 0 : i32
    return %arg0, %arg2 : i32, i32
  }
  func.func @transform_1(%arg0: i32, %arg1: i32, %arg2: i32) -> (i32, i32) {
    %c0_i32 = arith.constant 0 : i32
    return %arg2, %arg1 : i32, i32
  }
  func.func @transform_2(%arg0: i32, %arg1: i32, %arg2: i32) -> (i32, i32) {
    %c0_i32 = arith.constant 0 : i32
    %c0_i32_0 = arith.constant 0 : i32
    return %c0_i32, %arg1 : i32, i32
  }
  func.func @transform_3(%arg0: i32, %arg1: i32, %arg2: i32) -> (i32, i32) {
    %c0_i32 = arith.constant 0 : i32
    return %arg0, %arg1 : i32, i32
  }
}

</mosaic_0001>

<bundles_post_ra>
// kernel: apply.1
= control target key start
LH: loop header
LB: loop body
LE: loop exit
PB: predicated region body
PF: predicated region fallthrough
CT: control target
= control target key end

     0   :  { %8 = vsyncpa [#allocation3], 0  ;;  %s293_s0 = inlined_call_operand.vmem [shape: f32[8,128], index: 0, kind: input, shape index: {}]   ;;  %s294_s1 = inlined_call_operand.hbm [shape: f32[128,128], index: 1, kind: input, shape index: {}]   ;;  %s295_s2 = inlined_call_operand.vmem [shape: f32[1,128], index: 2, kind: input, shape index: {}]   ;;  %s296_s3 = inlined_call_operand.hbm [shape: f32[8,128], index: 3, kind: output, shape index: {}]  }
   0x1   :  { %9 = vsyncpa [#allocation4], 0  ;;  %s255_s12 = smov [#allocation2]  }
   0x2   :  { %s17_s13 = sshll.u32 %s255_s12, 4  ;;  %s18_s13 = int_to_ptr.vmem [resolvable:$true] %s17_s13 }
   0x3   :  { %s219_s14 = scalar_lea.vmem %s18_s13, 2048  ;;  %p224_p1 = scmp.lt.s32.totalorder %s18_s13, %s18_s13 }
   0x4   :  { %p220_p0 = scmp.ne.s32.totalorder %s18_s13, %s219_s14  ;;  %p225_p2 = scmp.lt.s32.totalorder %s219_s14, %s219_s14 }
   0x6   :  { %p226_p3 = por %p225_p2, %p224_p1 }
   0x8   :  { %p227_p4 = pnand %p226_p3, %p220_p0 }
   0xa   :  { %230 = shalt.err (!%p227_p4)
}
   0xb   :  { %s256_s15 = smov 128   ;;  %s257_s16 = smov 8  }
   0xc   :  { %23 = dma.hbm_to_vmem [thread:$0]  %s294_s1, 2048, %s18_s13, [#allocation3], %s256_s15, %s256_s15, %s257_s16  }
   0xd   :  { %251 = dma.done.wait [#allocation3], 2048  }
   0xe   :  { %252 = vsyncadd [#allocation3], 4294965248  ;;  %v258_v0 = vmov 0.0   ;;  %vm259_vm0 = vmmov 0   ;;  %v51_v1 = vld [vmem:[#allocation2 + $0x78] sm:$0xff]  ;;  %v50_v2 = vld [vmem:[#allocation2 + $0x70] sm:$0xff] }
   0xf   :  { %170 = vmatprep.subr.mxu0 %v258_v0  ;;  %202 = vmatprep.mubr.msk.f32.mxu0 %vm259_vm0, %v258_v0  ;;  %v49_v3 = vld [vmem:[#allocation2 + $0x68] sm:$0xff]  ;;  %v48_v4 = vld [vmem:[#allocation2 + $0x60] sm:$0xff]  ;;  %v47_v5 = vld [vmem:[#allocation2 + $0x58] sm:$0xff]  ;;  %s260_s22 = smov [#allocation5]  }
  0x10   :  { %171 = vmatpush3.msra.mxu0 %v51_v1  ;;  %v46_v6 = vld [vmem:[#allocation2 + $0x50] sm:$0xff]  ;;  %v45_v7 = vld [vmem:[#allocation2 + $0x48] sm:$0xff]  ;;  %v44_v8 = vld [vmem:[#allocation2 + $0x40] sm:$0xff]  ;;  %s143_s23 = sshll.u32 %s260_s22, 4  ;;  %s144_s23 = int_to_ptr.vmem [resolvable:$true] %s143_s23 }
  0x11   :  { %172 = vmatprep.subr.mxu0 %v258_v0  ;;  %v43_v9 = vld [vmem:[#allocation2 + $0x38] sm:$0xff]  ;;  %v42_v10 = vld [vmem:[#allocation2 + $0x30] sm:$0xff]  ;;  %v41_v11 = vld [vmem:[#allocation2 + $0x28] sm:$0xff]  ;;  %s231_s24 = scalar_lea.vmem %s144_s23, 128  ;;  %p236_p6 = scmp.lt.s32.totalorder %s144_s23, %s144_s23 }
  0x12   :  { %173 = vmatpush3.msra.mxu0 %v50_v2  ;;  %v40_v12 = vld [vmem:[#allocation2 + $0x20] sm:$0xff]  ;;  %v39_v13 = vld [vmem:[#allocation2 + $0x18] sm:$0xff]  ;;  %v38_v14 = vld [vmem:[#allocation2 + $0x10] sm:$0xff]  ;;  %p232_p5 = scmp.ne.s32.totalorder %s144_s23, %s231_s24  ;;  %p237_p7 = scmp.lt.s32.totalorder %s231_s24, %s231_s24 }
  0x13   :  { %174 = vmatprep.subr.mxu0 %v258_v0  ;;  %v37_v15 = vld [vmem:[#allocation2 + $0x8] sm:$0xff]  ;;  %v36_v16 = vld [vmem:[#allocation2] sm:$0xff] }
  0x14   :  { %175 = vmatpush3.msra.mxu0 %v49_v3  ;;  %v35_v17 = vld [vmem:[%s293_s0] sm:$0xff]  ;;  %p238_p8 = por %p237_p7, %p236_p6 }
  0x15   :  { %176 = vmatprep.subr.mxu0 %v258_v0  ;;  %v152_v19 = vld [vmem:[%s295_s2] ss:$0 sm:$0xff] }
  0x16   :  { %177 = vmatpush3.msra.mxu0 %v48_v4  ;;  %p239_p9 = pnand %p238_p8, %p232_p5 }
  0x17   :  { %178 = vmatprep.subr.mxu0 %v258_v0 }
  0x18   :  { %179 = vmatpush3.msra.mxu0 %v47_v5 }
  0x19   :  { %180 = vmatprep.subr.mxu0 %v258_v0 }
  0x1a   :  { %181 = vmatpush3.msra.mxu0 %v46_v6 }
  0x1b   :  { %182 = vmatprep.subr.mxu0 %v258_v0 }
  0x1c   :  { %183 = vmatpush3.msra.mxu0 %v45_v7 }
  0x1d   :  { %184 = vmatprep.subr.mxu0 %v258_v0 }
  0x1e   :  { %185 = vmatpush3.msra.mxu0 %v44_v8 }
  0x1f   :  { %186 = vmatprep.subr.mxu0 %v258_v0 }
  0x20   :  { %187 = vmatpush3.msra.mxu0 %v43_v9 }
  0x21   :  { %188 = vmatprep.subr.mxu0 %v258_v0 }
  0x22   :  { %189 = vmatpush3.msra.mxu0 %v42_v10 }
  0x23   :  { %190 = vmatprep.subr.mxu0 %v258_v0 }
  0x24   :  { %191 = vmatpush3.msra.mxu0 %v41_v11 }
  0x25   :  { %192 = vmatprep.subr.mxu0 %v258_v0 }
  0x26   :  { %193 = vmatpush3.msra.mxu0 %v40_v12 }
  0x27   :  { %194 = vmatprep.subr.mxu0 %v258_v0 }
  0x28   :  { %195 = vmatpush3.msra.mxu0 %v39_v13 }
  0x29   :  { %196 = vmatprep.subr.mxu0 %v258_v0 }
  0x2a   :  { %197 = vmatpush3.msra.mxu0 %v38_v14 }
  0x2b   :  { %198 = vmatprep.subr.mxu0 %v258_v0 }
  0x2c   :  { %199 = vmatpush3.msra.mxu0 %v37_v15 }
  0x2d   :  { %200 = vmatprep.subr.mxu0 %v258_v0 }
  0x2e   :  { %201 = vmatpush3.msra.mxu0 %v36_v16 }
  0x2f   :  { %203 = vmatmul.mubr.f32.vlgmr.msra.gmra.mxu0 %v35_v17 }
  0xef   :  { %v118_v18 = vpop.f32.mrf.mxu0 }
  0xf0   :  { %v135_v21 = vadd.f32 %v152_v19, %v118_v18 }
  0xf1   :  { %v204_v20 = vpop.f32.mrf.mxu0 }
  0xf2   :  { %136 = vst [vmem:[#allocation5] sm:$0xff] %v135_v21 }
  0xf3   :  { %242 = shalt.err (!%p239_p9)
}
  0xf4   :  { %146 = dma.vmem_to_hbm [thread:$0]  %s144_s23, 128, %s296_s3, [#allocation4]  }
  0xf5   :  { %253 = dma.done.wait [#allocation4], 128  }
  0xf6   :  { %254 = vsyncadd [#allocation4], 4294967168 }
  0xf7   :  { %150 = vsyncpa [#allocation3], 1 }
  0xf8   :  { %151 = vsyncpa [#allocation4], 1 }

</bundles_post_ra>
